<compile_context>
chip_gen: v7x
topology: tpu7x:2x2x1
jax: 0.10.0
libtpu: 0.0.40
codegen_flags: <defaults>
</compile_context>

<pallas_src>
import functools

import jax
import jax.numpy as jnp
from jax import lax
from jax.experimental import pallas as pl
from jax.experimental.pallas import tpu as pltpu

_NUM_SPLITS = 2                       # split the stream across v7x's 2 TCs
_TARGET_TILE_BYTES = 2 << 20          # ~2 MiB per input buffer per grid step
_VMEM_LIMIT_BYTES = 32 * 1024 * 1024  # explicit scoped-VMEM limit (portable)
_MAX_RESIDENT_LATENT_BYTES = 16 * 1024 * 1024


def _as_2d(x):
    if x.ndim == 0:
        return x.reshape(1, 1)
    if x.ndim == 1:
        return x.reshape(1, x.shape[0])
    return x.reshape(-1, x.shape[-1])


def _sse_partial_kernel(pred_ref, target_ref, out_ref, *, tile_rows, num_rows,
                        tiles_per_split, needs_mask):
    """Per-core partial sum of squared differences (lane-parallel accumulator)."""
    c = pl.program_id(0)   # core split (parallel)
    j = pl.program_id(1)   # row-tile index within this split (arbitrary)

    @pl.when(j == 0)
    def _():
        out_ref[...] = jnp.zeros_like(out_ref)

    # Upcast in-kernel; inputs stream through HBM in their native dtype.
    d = pred_ref[...].astype(jnp.float32) - target_ref[...].astype(jnp.float32)
    sq = d * d

    if needs_mask:
        # Mask rows that are past the end of the array (partial edge tile) or
        # belong to a phantom tile of the odd core split.  jnp.where (not a
        # multiply) so undefined OOB data cannot poison the sum.
        start = (c * tiles_per_split + j) * tile_rows
        row = lax.broadcasted_iota(jnp.int32, sq.shape, 0) + start
        sq = jnp.where(row < num_rows, sq, jnp.float32(0.0))

    # Sublane-only reduce in the hot loop; cross-lane reduce happens once in
    # the finalize kernel.
    out_ref[...] += jnp.sum(sq, axis=0, keepdims=True)[None]


def _finalize_kernel(part_ref, mu_ref, logvar_ref, out_ref, *, inv_n,
                     neg_half_over_b):
    """Combine per-core SSE partials and add the KLD term."""
    sse = jnp.sum(part_ref[...])
    mse = sse * inv_n

    mu = mu_ref[...].astype(jnp.float32)
    lv = logvar_ref[...].astype(jnp.float32)
    kld_sum = jnp.sum(1.0 + lv - mu * mu - jnp.exp(lv))

    out_ref[0, 0] = mse + kld_sum * neg_half_over_b


def my_loss(pred, target, mu, logvar):
    """Pallas implementation of MyLoss.forward: mse_loss(pred, target) + KLD/B."""
    pred = jnp.asarray(pred)
    target = jnp.asarray(target)
    mu = jnp.asarray(mu)
    logvar = jnp.asarray(logvar)

    n_elems = pred.size
    batch = mu.shape[0]
    inv_n = 1.0 / float(n_elems)
    neg_half_over_b = -0.5 / float(batch)

    # Native 2-D view (free reshape — no data movement / repack).
    pred2d = _as_2d(pred)
    target2d = _as_2d(target)
    R, C = pred2d.shape
    itemsize = pred2d.dtype.itemsize

    # Dtype-aware tile rows: ~_TARGET_TILE_BYTES per input buffer per step.
    rows_by_bytes = max(8, (_TARGET_TILE_BYTES // max(C * itemsize, 1)) // 8 * 8)
    tile_rows = min(rows_by_bytes, R)          # == R (full dim) for short arrays

    num_row_tiles = -(-R // tile_rows)
    tiles_per_split = -(-num_row_tiles // _NUM_SPLITS)
    needs_mask = (R % tile_rows != 0) or (num_row_tiles % _NUM_SPLITS != 0)

    def tile_map(c, j):
        # Clamp phantom tiles of the odd split onto a real tile (their rows are
        # fully masked in-kernel anyway).
        return (jnp.minimum(c * tiles_per_split + j, num_row_tiles - 1), 0)

    kernel = functools.partial(
        _sse_partial_kernel,
        tile_rows=tile_rows,
        num_rows=R,
        tiles_per_split=tiles_per_split,
        needs_mask=needs_mask,
    )

    partials = pl.pallas_call(
        kernel,
        out_shape=jax.ShapeDtypeStruct((_NUM_SPLITS, 1, C), jnp.float32),
        grid_spec=pltpu.PrefetchScalarGridSpec(
            num_scalar_prefetch=0,
            grid=(_NUM_SPLITS, tiles_per_split),
            in_specs=[
                pl.BlockSpec((tile_rows, C), tile_map),
                pl.BlockSpec((tile_rows, C), tile_map),
            ],
            out_specs=pl.BlockSpec((1, 1, C), lambda c, j: (c, 0, 0)),
        ),
        compiler_params=pltpu.CompilerParams(
            dimension_semantics=("parallel", "arbitrary"),
            vmem_limit_bytes=_VMEM_LIMIT_BYTES,
        ),
        cost_estimate=pl.CostEstimate(
            flops=3 * n_elems,
            transcendentals=0,
            bytes_accessed=2 * n_elems * itemsize + _NUM_SPLITS * C * 4,
        ),
    )(pred2d, target2d)

    mu2d = _as_2d(mu)
    logvar2d = _as_2d(logvar)
    latent_bytes = (mu2d.size + logvar2d.size) * 4

    if latent_bytes <= _MAX_RESIDENT_LATENT_BYTES:
        fin = functools.partial(
            _finalize_kernel, inv_n=inv_n, neg_half_over_b=neg_half_over_b)
        out = pl.pallas_call(
            fin,
            out_shape=jax.ShapeDtypeStruct((1, 1), jnp.float32),
            in_specs=[
                pl.BlockSpec(memory_space=pltpu.VMEM),
                pl.BlockSpec(memory_space=pltpu.VMEM),
                pl.BlockSpec(memory_space=pltpu.VMEM),
            ],
            out_specs=pl.BlockSpec(memory_space=pltpu.SMEM),
            cost_estimate=pl.CostEstimate(
                flops=5 * mu2d.size + _NUM_SPLITS * C,
                transcendentals=logvar2d.size,
                bytes_accessed=latent_bytes + _NUM_SPLITS * C * 4 + 4,
            ),
        )(partials, mu2d, logvar2d)
        return out[0, 0]

    # Size guard for unusually large latents (would not fit as whole-array VMEM
    # blocks): tiny KLD falls back to XLA; the heavy MSE stream stays in Pallas.
    mse = jnp.sum(partials) * inv_n
    lv = logvar.astype(jnp.float32)
    muf = mu.astype(jnp.float32)
    kld = neg_half_over_b * jnp.sum(1.0 + lv - muf * muf - jnp.exp(lv))
    return mse + kld


def _reference(pred, target, mu, logvar):
    pred = jnp.asarray(pred, jnp.float32)
    target = jnp.asarray(target, jnp.float32)
    mu = jnp.asarray(mu, jnp.float32)
    logvar = jnp.asarray(logvar, jnp.float32)
    mse = jnp.mean((pred - target) ** 2)
    kld = -0.5 * jnp.sum(1.0 + logvar - mu**2 - jnp.exp(logvar)) / mu.shape[0]
    return mse + kld


if __name__ == "__main__":
    key = jax.random.PRNGKey(0)
    k1, k2, k3, k4 = jax.random.split(key, 4)

    # Small shapes consistent with the module: (batch, features) + (batch, latent).
    batch, features, latent = 2, 32, 8
    pred = jax.random.normal(k1, (batch, features), jnp.float32)
    target = jax.random.normal(k2, (batch, features), jnp.float32)
    mu = jax.random.normal(k3, (batch, latent), jnp.float32)
    logvar = 0.1 * jax.random.normal(k4, (batch, latent), jnp.float32)

    out = my_loss(pred, target, mu, logvar)
    jax.block_until_ready(out)
    ref = _reference(pred, target, mu, logvar)
    assert jnp.allclose(out, ref, rtol=1e-5, atol=1e-5), (out, ref)

    # bf16 streaming path: both core-splits do real work, no masking needed.
    bp = jax.random.normal(k1, (2048, 1024), jnp.bfloat16)
    bt = jax.random.normal(k2, (2048, 1024), jnp.bfloat16)
    bm = jax.random.normal(k3, (64, 16), jnp.float32)
    blv = 0.1 * jax.random.normal(k4, (64, 16), jnp.float32)
    ob = my_loss(bp, bt, bm, blv)
    jax.block_until_ready(ob)
    rb = _reference(bp, bt, bm, blv)
    assert jnp.allclose(ob, rb, rtol=2e-2, atol=2e-2), (ob, rb)

    # f32 path with a partial last tile + phantom tile on the second split
    # (exercises the in-kernel row mask and multi-tile accumulation).
    mp = jax.random.normal(k1, (2500, 512), jnp.float32)
    mt = jax.random.normal(k2, (2500, 512), jnp.float32)
    mm = jax.random.normal(k3, (100, 32), jnp.float32)
    mlv = 0.1 * jax.random.normal(k4, (100, 32), jnp.float32)
    om = my_loss(mp, mt, mm, mlv)
    jax.block_until_ready(om)
    rm = _reference(mp, mt, mm, mlv)
    assert jnp.allclose(om, rm, rtol=1e-4, atol=1e-4), (om, rm)

    print("KERNEL_OK")
</pallas_src>

<mosaic_0001>
module attributes {stable_mosaic.version = 11 : i64} {
  func.func @_sse_partial_kernel(%arg0: i32, %arg1: i32, %arg2: memref<2x32xf32, #tpu.memory_space<vmem>>, %arg3: memref<2x32xf32, #tpu.memory_space<vmem>>, %arg4: memref<1x1x32xf32, #tpu.memory_space<vmem>>) attributes {dimension_semantics = [#tpu.dimension_semantics<parallel>, #tpu.dimension_semantics<arbitrary>], iteration_bounds = array<i64: 2, 1>, scalar_prefetch = 0 : i64, scratch_operands = 0 : i64, tpu.core_type = #tpu.core_type<tc>, window_params = [{transform_indices = @transform_0, window_bounds = array<i64: 2, 32>}, {transform_indices = @transform_1, window_bounds = array<i64: 2, 32>}, {transform_indices = @transform_2, window_bounds = array<i64: 1, 1, 32>}]} {
    %c0_i32 = arith.constant 0 : i32
    %0 = arith.cmpi eq, %arg1, %c0_i32 : i32
    %1 = arith.extui %0 : i1 to i32
    %c0_i32_0 = arith.constant 0 : i32
    %2 = arith.cmpi ne, %1, %c0_i32_0 : i32
    scf.if %2 {
      %cst_12 = arith.constant 0.000000e+00 : f32
      %23 = vector.broadcast %cst_12 : f32 to vector<1x1x32xf32>
      %c0_13 = arith.constant 0 : index
      %c0_14 = arith.constant 0 : index
      %c0_15 = arith.constant 0 : index
      %24 = vector.load %arg4[%c0_13, %c0_14, %c0_15] : memref<1x1x32xf32, #tpu.memory_space<vmem>>, vector<1x1x32xf32>
      tpu.vector_store %arg4[%c0_13, %c0_14, %c0_15], %23 {strides = array<i32>} : memref<1x1x32xf32, #tpu.memory_space<vmem>>, vector<1x1x32xf32>,
    } else {
    }
    %c0 = arith.constant 0 : index
    %c0_1 = arith.constant 0 : index
    %3 = vector.load %arg2[%c0, %c0_1] : memref<2x32xf32, #tpu.memory_space<vmem>>, vector<2x32xf32>
    %c0_2 = arith.constant 0 : index
    %c0_3 = arith.constant 0 : index
    %4 = vector.load %arg3[%c0_2, %c0_3] : memref<2x32xf32, #tpu.memory_space<vmem>>, vector<2x32xf32>
    %5 = arith.subf %3, %4 : vector<2x32xf32>
    %6 = arith.mulf %5, %5 : vector<2x32xf32>
    %c1_i32 = arith.constant 1 : i32
    %7 = arith.muli %arg0, %c1_i32 : i32
    %8 = arith.addi %7, %arg1 : i32
    %c2_i32 = arith.constant 2 : i32
    %9 = arith.muli %8, %c2_i32 : i32
    %10 = tpu.iota {dimensions = array<i32: 0>} : vector<2x32xi32>
    %11 = vector.broadcast %9 : i32 to vector<2x32xi32>
    %12 = arith.addi %10, %11 : vector<2x32xi32>
    %c2_i32_4 = arith.constant 2 : i32
    %13 = vector.broadcast %c2_i32_4 : i32 to vector<2x32xi32>
    %14 = arith.cmpi slt, %12, %13 : vector<2x32xi32>
    %cst = arith.constant 0.000000e+00 : f32
    %15 = vector.broadcast %cst : f32 to vector<2x32xf32>
    %16 = arith.select %14, %6, %15 : vector<2x32xi1>, vector<2x32xf32>
    %c0_5 = arith.constant 0 : index
    %c0_6 = arith.constant 0 : index
    %c0_7 = arith.constant 0 : index
    %17 = vector.load %arg4[%c0_5, %c0_6, %c0_7] : memref<1x1x32xf32, #tpu.memory_space<vmem>>, vector<1x1x32xf32>
    %cst_8 = arith.constant dense<0.000000e+00> : vector<32xf32>
    %18 = vector.multi_reduction <add>, %16, %cst_8 [0] : vector<2x32xf32> to vector<32xf32>
    %19 = vector.shape_cast %18 : vector<32xf32> to vector<1x32xf32>
    %20 = vector.shape_cast %19 : vector<1x32xf32> to vector<1x1x32xf32>
    %21 = arith.addf %17, %20 : vector<1x1x32xf32>
    %c0_9 = arith.constant 0 : index
    %c0_10 = arith.constant 0 : index
    %c0_11 = arith.constant 0 : index
    %22 = vector.load %arg4[%c0_9, %c0_10, %c0_11] : memref<1x1x32xf32, #tpu.memory_space<vmem>>, vector<1x1x32xf32>
    tpu.vector_store %arg4[%c0_9, %c0_10, %c0_11], %21 {strides = array<i32>} : memref<1x1x32xf32, #tpu.memory_space<vmem>>, vector<1x1x32xf32>,
    return
  }
  func.func @transform_0(%arg0: i32, %arg1: i32) -> (i32, i32) {
    %c1_i32 = arith.constant 1 : i32
    %0 = arith.muli %arg0, %c1_i32 : i32
    %1 = arith.addi %0, %arg1 : i32
    %c0_i32 = arith.constant 0 : i32
    %2 = arith.minsi %1, %c0_i32 : i32
    %c0_i32_0 = arith.constant 0 : i32
    %c0_i32_1 = arith.constant 0 : i32
    return %2, %c0_i32_0 : i32, i32
  }
  func.func @transform_1(%arg0: i32, %arg1: i32) -> (i32, i32) {
    %c1_i32 = arith.constant 1 : i32
    %0 = arith.muli %arg0, %c1_i32 : i32
    %1 = arith.addi %0, %arg1 : i32
    %c0_i32 = arith.constant 0 : i32
    %2 = arith.minsi %1, %c0_i32 : i32
    %c0_i32_0 = arith.constant 0 : i32
    %c0_i32_1 = arith.constant 0 : i32
    return %2, %c0_i32_0 : i32, i32
  }
  func.func @transform_2(%arg0: i32, %arg1: i32) -> (i32, i32, i32) {
    %c0_i32 = arith.constant 0 : i32
    %c0_i32_0 = arith.constant 0 : i32
    %c0_i32_1 = arith.constant 0 : i32
    return %arg0, %c0_i32, %c0_i32_0 : i32, i32, i32
  }
}

</mosaic_0001>

<bundles_post_ra>
// kernel: tpu_custom_call.1
= control target key start
LH: loop header
LB: loop body
LE: loop exit
PB: predicated region body
PF: predicated region fallthrough
CT: control target
= control target key end

     0   :  { %7 = vsyncpa [#allocation3], 0  ;;  %s782_s0 = inlined_call_operand.hbm [shape: f32[2,32], index: 0, kind: input, shape index: {}]   ;;  %s783_s1 = inlined_call_operand.vmem [shape: f32[2,32], index: 1, kind: input, shape index: {}]   ;;  %s784_s2 = inlined_call_operand.hbm [shape: f32[2,1,32], index: 2, kind: output, shape index: {}]  }
   0x1   :  { %9 = vsyncpa [#allocation3 + $0x1], 0 }
   0x2   :  { %10 = vsyncpa [#allocation4], 0 }
   0x3   :  { %12 = vsyncpa [#allocation4 + $0x1], 0  ;;  %s605_s9 = smov 0   ;;  %s607_s10 = smov 0  }
   0x4   :  { %s609_s11 = smov 0   ;;  %s611_s12 = smov 0  }
   0x5   :  { %s613_s13 = smov 0   ;;  %s615_s14 = smov 0  }
   0x6   :  { %s617_s15 = smov 0   ;;  %s619_s16 = smov 0  }
   0x7 LB: > { %s349_s17 = sadd.s32 4294967295, %s585_s16   ;;  %s350_s18 = sadd.s32 4294967294, %s585_s16   ;;  %s585_s16 = sphi %s619_s16, %s18_s16   ;;  %s581_s15 = sphi %s617_s15, %s805_s15   ;;  %s577_s14 = sphi %s615_s14, %s804_s14   ;;  %s573_s13 = sphi %s613_s13, %s772_s13   ;;  %s569_s12 = sphi %s611_s12, %s803_s12   ;;  %s565_s11 = sphi %s609_s11, %s802_s11   ;;  %s561_s10 = sphi %s607_s10, %s801_s10   ;;  %s557_s9 = sphi %s605_s9, %s800_s9  }
   0x8   : > { %s30_s19 = sadd.s32 1, %s581_s15  ;;  %p554_p1 = scmp.ne.s32.totalorder %s573_s13, 0 }
   0x9   : > { %p32_p0 = scmp.ge.s32.totalorder %s30_s19, 2  ;;  %p51_p2 = scmp.eq.s32.totalorder %s585_s16, 0 }
   0xa   : > { %p56_p3 = scmp.ne.s32.totalorder %s573_s13, %s569_s12  ;;  %p57_p5 = scmp.eq.s32.totalorder %s349_s17, 0 }
   0xb   : > { %s807_s19 = smov (%p32_p0, %s30_s19), 0  ;;  %p651_p4 = por %p554_p1, %p51_p2 }
   0xc   : > { %p655_p6 = por %p57_p5, %p56_p3  ;;  %s98_s22 = ssub.s32 %s581_s15, %s807_s19 }
   0xd   : > { %p99_p7 = scmp.eq.s32.totalorder %s98_s22, 0  ;;  %s101_s23 = sadd.s32 1, %s565_s11 }
   0xe   : > { %s789_s21 = scalar_select %p655_p6, 1, 0 }
   0xf   : > { %s663_s24 = scalar_select %p99_p7, %s565_s11, %s101_s23  }
  0x10   : > { %p111_p8 = scmp.ne.s32.totalorder %s565_s11, %s561_s10  ;;  %p112_p9 = scmp.eq.s32.totalorder %s349_s17, 1 }
  0x11   : > { %p117_p10 = scmp.ne.s32.totalorder %s561_s10, %s557_s9  ;;  %p118_p11 = scmp.eq.s32.totalorder %s350_s18, 1 }
  0x12   : > { %p669_p12 = por %p112_p9, %p111_p8  ;;  %p377_p1 = scmp.lt.s32.totalorder %s585_s16, 2 }
  0x13   : > { %p674_p0 = por %p118_p11, %p117_p10  ;;  %s587_s27 = smov [#allocation2]  }
  0x14   : > { %s790_s25 = scalar_select %p669_p12, 1, 0 }
  0x15   : > { %s791_s26 = scalar_select %p674_p0, 1, 0 }
  0x16   : > { %s152_s28 = sshll.u32 %s587_s27, 4  ;;  %p681_p2 = pnand %p377_p1, %p651_p4  ;;  %s153_s28 = int_to_ptr.vmem [resolvable:$true] %s152_s28 }
  0x17   : > { %s452_s4 = scalar_lea.hbm %s782_s0, 32 }
  0x18   : > { %s792_s29 = scalar_select %p681_p2, 1, 0 }
  0x19   : > { %p453_p7 = scmp.ne.s32.totalorder %s782_s0, %s452_s4  ;;  %p454_p8 = pneg %p681_p2 }
  0x1a   : > { %p459_p4 = scmp.lt.u32.totalorder %s452_s4, %s452_s4  ;;  %p461_p11 = scmp.lt.u32.totalorder %s452_s4, %s782_s0 }
  0x1b   : > { %p455_p9 = pnand %p454_p8, %p453_p7 }
  0x1c   : > { %p462_p1 = por %p461_p11, %p459_p4 }
  0x1d   : > { %p456_p10 = pneg %p455_p9 }
  0x1f   : > { %p463_p13 = pnand %p462_p1, %p456_p10 }
  0x21   : > { %466 = shalt.err (!%p463_p13)
}
  0x22   : > { %s467_s12 = scalar_lea.vmem %s153_s28, 32  ;;  %s474_s17 = scalar_lea.vmem %s153_s28, 64 }
  0x23   : > { %p468_p3 = scmp.ne.s32.totalorder %s153_s28, %s467_s12  ;;  %p475_p12 = scmp.lt.s32.totalorder %s153_s28, %s153_s28 }
  0x24   : > { %p476_p6 = scmp.lt.s32.totalorder %s474_s17, %s467_s12 }
  0x25   : > { %p470_p5 = pnand %p468_p3, %p454_p8 }
  0x26   : > { %p477_p2 = por %p476_p6, %p475_p12 }
  0x27   : > { %p471_p0 = pneg %p470_p5 }
  0x29   : > { %p478_p7 = pnand %p477_p2, %p471_p0 }
  0x2b   : > { %481 = shalt.err (!%p478_p7)
}
  0x2c   : > { %p793_p9 = scmp.ne.s32.totalorder %s792_s29, 0  ;;  %p794_p10 = scmp.lt.s32.totalorder %s585_s16, 3 }
  0x2d   : > { %p795_p13 = scmp.ge.s32.totalorder %s585_s16, 1 }
  0x2e   : > { %372 = dma.hbm_to_vmem [thread:$0]  (!%p793_p9), %s782_s0, 32, %s153_s28, [#allocation3]  }
  0x2f   : > { %p171_p4 = pnand %p795_p13, %p794_p10 }
  0x30   : > { %s176_s22 = sand.u32 (!%p171_p4), 1, %s573_s13   ;;  %p796_p6 = scmp.ne.s32.totalorder (!%p171_p4), %s789_s21, 0 }
  0x31   : > { %174 = sbr.rel (%p171_p4) target bundleno = 99 (0x63), region = 28  ;;  %s356_s23 = sshll.u32 (!%p171_p4), %s176_s22, 1 }
  0x32   : > { %s177_s27 = scalar_lea.sflag (!%p171_p4), [#allocation3], %s176_s22  ;;  %s180_s30 = scalar_lea.vmem (!%p171_p4), [#allocation2], %s356_s23 }
  0x38   : > { %547 = dma.done.wait (%p796_p6), %s177_s27, 32  }
  0x39   : > { %549 = vsyncadd (%p796_p6), %s177_s27, 4294967264  ;;  %s205_s28 = sand.u32 1, %s561_s10   ;;  %p211_p12 = scmp.lt.s32.totalorder %s577_s14, 0  ;;  %vm224_vm0 = vcmask 253952   ;;  %v232_v0 = vlaneseq  ;;  %v588_v1 = vmov 0.0   ;;  %vm239_vm2 = vcmask 254976  }
  0x3a   : > { %s361_s29 = sshll.u32 %s577_s14, 1  ;;  %s206_s4 = scalar_lea.vmem [#allocation5], %s205_s28  ;;  %v226_v5 = vld [vmem:[%s180_s30] sm:$0x3] }
  0x3b   : > { %s212_s3 = scalar_select %p211_p12, %s577_s14, 0  ;;  %225 = vst.msk [vmem:[%s206_s4] sm:$0x1] %vm224_vm0, %v588_v1  ;;  %v233_v2 = vshrl.u32 %v232_v0, 7  ;;  %v234_v3 = vstv %s361_s29 }
  0x3c   : > { %s362_s8 = sshll.u32 %s577_s14, 4  ;;  %s263_s12 = sshll.u32 %s206_s4, 4  ;;  %s728_s12 = int_to_ptr.vmem [resolvable:$true] %s263_s12 }
  0x3d   : > { %s809_s3 = smov (!%p211_p12, %s212_s3), 0  ;;  %v235_v4 = vadd.s32 %v234_v3, %v233_v2  ;;  %s726_s20 = scalar_lea.hbm %s784_s2, %s362_s8 }
  0x3e   : > { %s360_s21 = sshll.u32 %s809_s3, 1  ;;  %s251_s22 = scalar_lea.sflag [#allocation4], %s205_s28 }
  0x3f   : > { %s216_s7 = scalar_lea.vmem %s783_s1, %s360_s21  ;;  %vm236_vm1 = vcmp.lt.s32.totalorder %v235_v4, 2  ;;  %s482_s23 = scalar_lea.vmem %s728_s12, 16 }
  0x40   : > { %v227_v6 = vld [vmem:[%s216_s7] sm:$0x3]  ;;  %p483_p0 = scmp.ne.s32.totalorder %s728_s12, %s482_s23  ;;  %p797_p2 = scmp.ne.s32.totalorder %s790_s25, 0 }
  0x41   : > { %v228_v7 = vsub.f32 %v226_v5, %v227_v6  ;;  %s589_s14 = smov [#allocation5]  }
  0x42   : > { %v238_v16 = vld [vmem:[%s206_s4] sm:$0x1]  ;;  %p484_p3 = pnand %p483_p0, %p797_p2  ;;  %s486_s27 = sshll.u32 %s589_s14, 4  ;;  %s487_s27 = int_to_ptr.vmem [resolvable:$false] %s486_s27 }
  0x43   : > { %v229_v8 = vmul.f32 %v228_v7, %v228_v7  ;;  %s488_s30 = scalar_lea.vmem %s487_s27, 32  ;;  %p489_p8 = scmp.lt.s32.totalorder %s728_s12, %s487_s27 }
  0x44   : > { %p485_p5 = pneg %p484_p3  ;;  %p490_p11 = scmp.lt.s32.totalorder %s488_s30, %s482_s23 }
  0x45   : > { %v237_v9 = vsel %vm236_vm1, %v229_v8, 0.0 }
  0x46   : > { %v240_v10 = vsel %vm239_vm2, %v237_v9, 0.0  ;;  %p491_p1 = por %p490_p11, %p489_p8 }
  0x47   : > { %v241_v11 = vrot.slane %v240_v10, 4 }
  0x48   : > { %p492_p7 = pnand %p491_p1, %p485_p5 }
  0x49   : > { %v242_v12 = vadd.f32 %v241_v11, %v240_v10 }
  0x4b   : > { %v243_v13 = vrot.slane %v242_v12, 2 }
  0x4d   : > { %v244_v14 = vadd.f32 %v243_v13, %v242_v12 }
  0x4f   : > { %v245_v15 = vrot.slane %v244_v14, 1 }
  0x51   : > { %v246_v17 = vadd.f32 %v245_v15, %v244_v14 }
  0x53   : > { %v247_v18 = vadd.f32 %v246_v17, %v238_v16 }
  0x55   : > { %249 = vst.msk [vmem:[%s206_s4] sm:$0x1] %vm224_vm0, %v247_v18 }
  0x56   : > { %495 = shalt.err (!%p492_p7)
}
  0x57   : > { %s496_s28 = scalar_lea.hbm %s726_s20, 16  ;;  %s500_s4 = scalar_lea.hbm %s784_s2, 32 }
  0x58   : > { %p497_p9 = scmp.ne.s32.totalorder %s726_s20, %s496_s28  ;;  %p501_p4 = scmp.lt.u32.totalorder %s726_s20, %s784_s2 }
  0x59   : > { %p502_p6 = scmp.lt.u32.totalorder %s500_s4, %s496_s28  ;;  %p504_p0 = scmp.lt.u32.totalorder %s496_s28, %s726_s20 }
  0x5a   : > { %p498_p10 = pnand %p497_p9, %p797_p2 }
  0x5b   : > { %p503_p12 = por %p502_p6, %p501_p4 }
  0x5c   : > { %p499_p13 = pneg %p498_p10 }
  0x5d   : > { %p505_p3 = por %p504_p0, %p503_p12 }
  0x5f   : > { %p506_p5 = pnand %p505_p3, %p499_p13 }
  0x61   : > { %509 = shalt.err (!%p506_p5)
}
  0x62   : > { %367 = dma.vmem_to_hbm [thread:$0]  (%p797_p2), %s728_s12, 16, %s726_s20, %s251_s22  }
  0x63 PF: > { %s275_s6 = sand.u32 1, %s557_s9   ;;  %p798_p8 = scmp.ne.s32.totalorder %s791_s26, 0 }
  0x64   : > { %p799_p11 = scmp.ge.s32.totalorder %s585_s16, 2  ;;  %s276_s7 = scalar_lea.sflag [#allocation4], %s275_s6 }
  0x66   : > { %p374_p1 = pnand %p799_p11, %p798_p8 }
  0x68   : > { %551 = dma.done.wait (!%p374_p1), %s276_s7, 16  }
  0x69   : > { %553 = vsyncadd (!%p374_p1), %s276_s7, 4294967280  ;;  %s18_s16 = sadd.s32 1, %s585_s16   ;;  %s800_s9 = smov %s561_s10 }
  0x6a   : > { %p15_p7 = scmp.ge.s32.totalorder %s18_s16, 4   ;;  %s801_s10 = smov %s565_s11 }
  0x6b   : > { %s802_s11 = smov %s663_s24  ;;  %s803_s12 = smov %s573_s13 }
  0x6c   : > { %s772_s13 = smov 0   ;;  %s804_s14 = smov %s581_s15 }
  0x6d   : > { %s805_s15 = smov %s807_s19  ;;  %17 = sbr.rel (!%p15_p7) target bundleno = 7 (0x7), region = 80 }
  0x74   :  { %280 = vsyncpa [#allocation3], 1 }
  0x75   :  { %282 = vsyncpa [#allocation3 + $0x1], 1 }
  0x76   :  { %283 = vsyncpa [#allocation4], 1 }
  0x77   :  { %285 = vsyncpa [#allocation4 + $0x1], 1 }

</bundles_post_ra>
